<compile_context>
chip_gen: v7x
topology: tpu7x:2x2x1
jax: 0.10.0
libtpu: 0.0.40
codegen_flags: <defaults>
</compile_context>

<pallas_src>
import jax
import jax.numpy as jnp
from jax.experimental import pallas as pl
from jax.experimental.pallas import tpu as pltpu


def _round_up(x, m):
    return ((x + m - 1) // m) * m


def _vmem_budget_bytes():
    """Usable VMEM budget: ~3/4 of physical per-core VMEM, capped at 100 MiB."""
    phys = 64 << 20  # conservative default (v7x per-core VMEM)
    try:
        info = pltpu.get_tpu_info()
        phys = int(getattr(info, "vmem_capacity_bytes", phys))
    except Exception:
        pass
    return min(phys * 3 // 4, 100 << 20)


def _estimate_vmem(tm, tn, d_pad, op_bytes):
    lhs = tm * d_pad * op_bytes * 2          # double-buffered LHS row tile
    rhs = d_pad * tn * op_bytes * 2          # double-buffered RHS column tile
    out = tm * 128 * 4 * 2                   # (tm,1) f32 output block (lane padded), 2 bufs
    acc = tm * 128 * 4                       # (tm,1) f32 accumulator scratch
    tmp = 2 * tm * tn * 4                    # f32 sim slab + its exp() temporary
    return lhs + rhs + out + acc + tmp


def _pick_tiles(n_pad, d_pad, op_bytes, budget_bytes):
    """Largest (tm, tn) whose working set fits the budget (tiles divide n_pad)."""
    best = None
    for tm in (512, 256, 128):
        if n_pad % tm:
            continue
        for tn in (2048, 1024, 512, 256, 128):
            if n_pad % tn:
                continue
            est = _estimate_vmem(tm, tn, d_pad, op_bytes)
            if est <= budget_bytes:
                return tm, tn, est
            if best is None or est < best[2]:
                best = (tm, tn, est)
    return best  # nothing fit the budget; take the smallest footprint


def _simclr_rowsum_kernel(lhs_ref, rhs_ref, o_ref, acc_ref):
    """Accumulate rowsum(exp(sim)) over column tiles of the similarity matrix."""
    j = pl.program_id(1)

    @pl.when(j == 0)
    def _init():
        acc_ref[...] = jnp.zeros_like(acc_ref)

    # (TM, Dp) x (Dp, TN) on the MXU with f32 accumulation; 1/T is already
    # folded into the LHS in the wrapper.
    sim = jnp.dot(lhs_ref[...], rhs_ref[...],
                  preferred_element_type=jnp.float32)              # (TM, TN) f32
    acc_ref[...] += jnp.sum(jnp.exp(sim), axis=-1, keepdims=True)  # (TM, 1)

    @pl.when(j == pl.num_programs(1) - 1)
    def _finalize():
        o_ref[...] = acc_ref[...]


def simclr_loss(proj_1, proj_2, temperature, *, matmul_dtype=jnp.bfloat16):
    """SimCLR loss (forward), semantics matching the PyTorch reference module."""
    B, D = proj_1.shape
    assert proj_2.shape == (B, D)
    n = 2 * B
    inv_t = jnp.float32(1.0 / float(temperature))

    d_pad = _round_up(D, 128)   # lane-align the feature dim
    n_pad = _round_up(n, 256)   # row/column pad; padded rows are zero

    out = jnp.zeros((n_pad, d_pad), jnp.float32)
    out = out.at[:B, :D].set(proj_1.astype(jnp.float32))
    out = out.at[B:n, :D].set(proj_2.astype(jnp.float32))

    out_cast = out.astype(matmul_dtype)
    lhs = (out * inv_t).astype(matmul_dtype)    # (n_pad, d_pad), 1/T folded in
    rhs = out_cast.T                            # (d_pad, n_pad) lane-dense RHS

    op_bytes = jnp.dtype(matmul_dtype).itemsize
    budget = _vmem_budget_bytes()
    tm, tn, est = _pick_tiles(n_pad, d_pad, op_bytes, budget * 2 // 3)
    vmem_limit = int(min(budget, max(est + (8 << 20), 32 << 20)))

    grid = (n_pad // tm, n_pad // tn)

    cost = pl.CostEstimate(
        flops=2 * n_pad * n_pad * d_pad,
        transcendentals=n_pad * n_pad,
        bytes_accessed=op_bytes * n_pad * d_pad * (1 + grid[0]) + 4 * n_pad,
    )

    acc = pl.pallas_call(
        _simclr_rowsum_kernel,
        out_shape=jax.ShapeDtypeStruct((n_pad, 1), jnp.float32),
        grid=grid,
        in_specs=[
            pl.BlockSpec((tm, d_pad), lambda i, j: (i, 0)),   # LHS row tile
            pl.BlockSpec((d_pad, tn), lambda i, j: (0, j)),   # RHS column tile
        ],
        out_specs=pl.BlockSpec((tm, 1), lambda i, j: (i, 0)),
        scratch_shapes=[pltpu.VMEM((tm, 1), jnp.float32)],
        compiler_params=pltpu.CompilerParams(
            dimension_semantics=("parallel", "arbitrary"),
            vmem_limit_bytes=vmem_limit),
        cost_estimate=cost,
    )(lhs, rhs)

    acc = acc[:n, 0]                                           # (n,) f32

    # Analytic removal of the diagonal + the zero-padded columns (exp(0) = 1
    # each).  The diagonal goes through the same matmul_dtype cast as the MXU
    # operands so it cancels the in-kernel value consistently.
    diag = jnp.exp(jnp.sum(lhs[:n].astype(jnp.float32) *
                           out_cast[:n].astype(jnp.float32), axis=-1))
    denom = acc - diag - jnp.float32(n_pad - n)

    # Positive-pair logit (no exp/log round-trip): -log(exp(pos)/denom).
    pos = jnp.sum(proj_1.astype(jnp.float32) * proj_2.astype(jnp.float32),
                  axis=-1) * inv_t                             # (B,)
    pos = jnp.concatenate([pos, pos], axis=0)                  # (n,)

    return jnp.mean(jnp.log(denom) - pos)


def _reference_loss(proj_1, proj_2, temperature):
    # Pure-JAX reference mirroring the PyTorch module exactly.
    B = proj_1.shape[0]
    out = jnp.concatenate([proj_1, proj_2], axis=0)
    sim = jnp.exp(out @ out.T / temperature)
    mask = ~jnp.eye(2 * B, dtype=bool)
    denom = jnp.sum(jnp.where(mask, sim, 0.0), axis=-1)
    pos = jnp.exp(jnp.sum(proj_1 * proj_2, axis=-1) / temperature)
    pos = jnp.concatenate([pos, pos], axis=0)
    return jnp.mean(-jnp.log(pos / denom))


if __name__ == "__main__":
    key = jax.random.PRNGKey(0)
    k1, k2 = jax.random.split(key)
    B, D = 8, 32
    temperature = 0.5

    # Roughly unit-norm projections keep exp() well conditioned (as in SimCLR).
    proj_1 = jax.random.normal(k1, (B, D), dtype=jnp.float32)
    proj_2 = jax.random.normal(k2, (B, D), dtype=jnp.float32)
    proj_1 = proj_1 / jnp.linalg.norm(proj_1, axis=-1, keepdims=True)
    proj_2 = proj_2 / jnp.linalg.norm(proj_2, axis=-1, keepdims=True)

    ref = _reference_loss(proj_1, proj_2, temperature)

    # f32 MXU operands -> tight match with the PyTorch/f32 reference.
    loss_f32 = simclr_loss(proj_1, proj_2, temperature, matmul_dtype=jnp.float32)
    jax.block_until_ready(loss_f32)
    assert jnp.allclose(loss_f32, ref, rtol=1e-4, atol=1e-4), (loss_f32, ref)

    # Default bf16-operand MXU fast path (f32 accumulation) -> relaxed tolerance.
    loss_bf16 = simclr_loss(proj_1, proj_2, temperature)
    jax.block_until_ready(loss_bf16)
    assert jnp.allclose(loss_bf16, ref, rtol=5e-2, atol=5e-2), (loss_bf16, ref)

    print("KERNEL_OK")
</pallas_src>

<mosaic_0001>
module attributes {stable_mosaic.version = 11 : i64} {
  func.func @_simclr_rowsum_kernel(%arg0: i32, %arg1: i32, %arg2: memref<256x128xf32, #tpu.memory_space<vmem>>, %arg3: memref<128x256xf32, #tpu.memory_space<vmem>>, %arg4: memref<256x1xf32, #tpu.memory_space<vmem>>, %arg5: memref<256x1xf32, #tpu.memory_space<vmem>>) attributes {dimension_semantics = [#tpu.dimension_semantics<parallel>, #tpu.dimension_semantics<arbitrary>], iteration_bounds = array<i64: 1, 1>, scalar_prefetch = 0 : i64, scratch_operands = 1 : i64, tpu.core_type = #tpu.core_type<tc>, window_params = [{transform_indices = @transform_0, window_bounds = array<i64: 256, 128>}, {transform_indices = @transform_1, window_bounds = array<i64: 128, 256>}, {transform_indices = @transform_2, window_bounds = array<i64: 256, 1>}]} {
    %c0_i32 = arith.constant 0 : i32
    %0 = arith.cmpi eq, %arg1, %c0_i32 : i32
    %1 = arith.extui %0 : i1 to i32
    %c0_i32_0 = arith.constant 0 : i32
    %2 = arith.cmpi ne, %1, %c0_i32_0 : i32
    scf.if %2 {
      %cst_11 = arith.constant 0.000000e+00 : f32
      %15 = vector.broadcast %cst_11 : f32 to vector<256x1xf32>
      %c0_12 = arith.constant 0 : index
      %c0_13 = arith.constant 0 : index
      %16 = vector.load %arg5[%c0_12, %c0_13] : memref<256x1xf32, #tpu.memory_space<vmem>>, vector<256x1xf32>
      tpu.vector_store %arg5[%c0_12, %c0_13], %15 {strides = array<i32>} : memref<256x1xf32, #tpu.memory_space<vmem>>, vector<256x1xf32>,
    } else {
    }
    %c0 = arith.constant 0 : index
    %c0_1 = arith.constant 0 : index
    %3 = vector.load %arg2[%c0, %c0_1] : memref<256x128xf32, #tpu.memory_space<vmem>>, vector<256x128xf32>
    %c0_2 = arith.constant 0 : index
    %c0_3 = arith.constant 0 : index
    %4 = vector.load %arg3[%c0_2, %c0_3] : memref<128x256xf32, #tpu.memory_space<vmem>>, vector<128x256xf32>
    %cst = arith.constant dense<0.000000e+00> : vector<256x256xf32>
    %5 = tpu.matmul %3, %4, %cst {dimension_numbers = #tpu.dot_dimension_numbers<[1], [0], [0], [1], [0, 0, 1, 1], [], []>} : vector<256x128xf32>, vector<128x256xf32>, vector<256x256xf32> -> vector<256x256xf32>
    %c0_4 = arith.constant 0 : index
    %c0_5 = arith.constant 0 : index
    %6 = vector.load %arg5[%c0_4, %c0_5] : memref<256x1xf32, #tpu.memory_space<vmem>>, vector<256x1xf32>
    %7 = math.exp %5 : vector<256x256xf32>
    %cst_6 = arith.constant dense<0.000000e+00> : vector<256xf32>
    %8 = vector.multi_reduction <add>, %7, %cst_6 [1] : vector<256x256xf32> to vector<256xf32>
    %9 = vector.shape_cast %8 : vector<256xf32> to vector<256x1xf32>
    %10 = arith.addf %6, %9 : vector<256x1xf32>
    %c0_7 = arith.constant 0 : index
    %c0_8 = arith.constant 0 : index
    %11 = vector.load %arg5[%c0_7, %c0_8] : memref<256x1xf32, #tpu.memory_space<vmem>>, vector<256x1xf32>
    tpu.vector_store %arg5[%c0_7, %c0_8], %10 {strides = array<i32>} : memref<256x1xf32, #tpu.memory_space<vmem>>, vector<256x1xf32>,
    %c0_i32_9 = arith.constant 0 : i32
    %12 = arith.cmpi eq, %arg1, %c0_i32_9 : i32
    %13 = arith.extui %12 : i1 to i32
    %c0_i32_10 = arith.constant 0 : i32
    %14 = arith.cmpi ne, %13, %c0_i32_10 : i32
    scf.if %14 {
      %c0_11 = arith.constant 0 : index
      %c0_12 = arith.constant 0 : index
      %15 = vector.load %arg5[%c0_11, %c0_12] : memref<256x1xf32, #tpu.memory_space<vmem>>, vector<256x1xf32>
      %c0_13 = arith.constant 0 : index
      %c0_14 = arith.constant 0 : index
      %16 = vector.load %arg4[%c0_13, %c0_14] : memref<256x1xf32, #tpu.memory_space<vmem>>, vector<256x1xf32>
      tpu.vector_store %arg4[%c0_13, %c0_14], %15 {strides = array<i32>} : memref<256x1xf32, #tpu.memory_space<vmem>>, vector<256x1xf32>,
    } else {
    }
    return
  }
  func.func @transform_0(%arg0: i32, %arg1: i32) -> (i32, i32) {
    %c0_i32 = arith.constant 0 : i32
    %c0_i32_0 = arith.constant 0 : i32
    return %arg0, %c0_i32 : i32, i32
  }
  func.func @transform_1(%arg0: i32, %arg1: i32) -> (i32, i32) {
    %c0_i32 = arith.constant 0 : i32
    %c0_i32_0 = arith.constant 0 : i32
    return %c0_i32, %arg1 : i32, i32
  }
  func.func @transform_2(%arg0: i32, %arg1: i32) -> (i32, i32) {
    %c0_i32 = arith.constant 0 : i32
    %c0_i32_0 = arith.constant 0 : i32
    return %arg0, %c0_i32 : i32, i32
  }
}

</mosaic_0001>

<bundles_post_ra>
// kernel: tpu_custom_call.1
= control target key start
LH: loop header
LB: loop body
LE: loop exit
PB: predicated region body
PF: predicated region fallthrough
CT: control target
= control target key end

     0   :  { %7 = vsyncpa [#allocation4], 0  ;;  %s1324_s0 = inlined_call_operand.hbm [shape: f32[256,128], index: 0, kind: input, shape index: {}]   ;;  %s1325_s1 = inlined_call_operand.hbm [shape: f32[128,256], index: 1, kind: input, shape index: {}]   ;;  %s1326_s2 = inlined_call_operand.vmem [shape: f32[256,1], index: 2, kind: output, shape index: {}]  }
   0x1   :  { %8 = vsyncpa [#allocation6], 0  ;;  %s1022_s9 = smov [#allocation3]   ;;  %s974_s13 = scalar_lea.hbm %s1324_s0, 4096 }
   0x2   :  { %s14_s10 = sshll.u32 %s1022_s9, 4  ;;  %p975_p0 = scmp.ne.s32.totalorder %s1324_s0, %s974_s13  ;;  %s15_s10 = int_to_ptr.vmem [resolvable:$true] %s14_s10 }
   0x3   :  { %p978_p1 = scmp.lt.u32.totalorder %s974_s13, %s1324_s0 }
   0x5   :  { %p980_p2 = pnand %p978_p1, %p975_p0 }
   0x7   :  { %983 = shalt.err (!%p980_p2)
}
   0x8   :  { %s984_s18 = scalar_lea.vmem %s15_s10, 4096  ;;  %p989_p4 = scmp.lt.s32.totalorder %s15_s10, %s15_s10 }
   0x9   :  { %p985_p3 = scmp.ne.s32.totalorder %s15_s10, %s984_s18  ;;  %p990_p5 = scmp.lt.s32.totalorder %s984_s18, %s984_s18 }
   0xb   :  { %p991_p6 = por %p990_p5, %p989_p4 }
   0xd   :  { %p992_p7 = pnand %p991_p6, %p985_p3 }
   0xf   :  { %995 = shalt.err (!%p992_p7)
}
  0x10   :  { %s1023_s19 = smov 128   ;;  %s1024_s20 = smov 8  }
  0x11   :  { %20 = dma.hbm_to_vmem [thread:$0]  %s1324_s0, 4096, %s15_s10, [#allocation4], %s1023_s19, %s1023_s19, %s1024_s20  }
  0x12   :  { %s1025_s23 = smov [#allocation5]   ;;  %s996_s27 = scalar_lea.hbm %s1325_s1, 4096 }
  0x13   :  { %s26_s24 = sshll.u32 %s1025_s23, 4  ;;  %p997_p8 = scmp.ne.s32.totalorder %s1325_s1, %s996_s27  ;;  %s27_s24 = int_to_ptr.vmem [resolvable:$true] %s26_s24 }
  0x14   :  { %p1000_p9 = scmp.lt.u32.totalorder %s996_s27, %s1325_s1 }
  0x16   :  { %p1002_p10 = pnand %p1000_p9, %p997_p8 }
  0x18   :  { %1005 = shalt.err (!%p1002_p10)
}
  0x19   :  { %s1006_s4 = scalar_lea.vmem %s27_s24, 4096  ;;  %p1011_p12 = scmp.lt.s32.totalorder %s27_s24, %s27_s24 }
  0x1a   :  { %p1007_p11 = scmp.ne.s32.totalorder %s27_s24, %s1006_s4  ;;  %p1012_p13 = scmp.lt.s32.totalorder %s1006_s4, %s1006_s4 }
  0x1c   :  { %p1013_p0 = por %p1012_p13, %p1011_p12 }
  0x1e   :  { %p1014_p1 = pnand %p1013_p0, %p1007_p11 }
  0x20   :  { %1017 = shalt.err (!%p1014_p1)
}
  0x21   :  { %s1026_s0 = smov 256   ;;  %s1027_s5 = smov 16  }
  0x22   :  { %32 = dma.hbm_to_vmem [thread:$0]  %s1325_s1, 4096, %s27_s24, [#allocation6], %s1026_s0, %s1026_s0, %s1027_s5  }
  0x23   :  { %1018 = dma.done.wait [#allocation4], 4096  }
  0x24   :  { %1019 = vsyncadd [#allocation4], 4294963200 }
  0x25   :  { %1020 = dma.done.wait [#allocation6], 4096  }
  0x26   :  { %1021 = vsyncadd [#allocation6], 4294963200  ;;  %v1028_v0 = vmov 0.0   ;;  %v109_v1 = vld [vmem:[#allocation5 + $0x8] sm:$0xff]  ;;  %v111_v2 = vld [vmem:[#allocation5 + $0x18] sm:$0xff]  ;;  %vm43_vm0 = vcmask 7168  }
  0x27   :  { %204 = vmatprep.mubr.f32.mxu0 %v1028_v0  ;;  %300 = vmatprep.mubr.f32.mxu1 %v1028_v0  ;;  %v108_v3 = vld [vmem:[#allocation5] sm:$0xff]  ;;  %v791_v4 = vpack.c.bf16 %v111_v2, %v109_v1  ;;  %v110_v5 = vld [vmem:[#allocation5 + $0x10] sm:$0xff]  ;;  %v113_v6 = vld [vmem:[#allocation5 + $0x28] sm:$0xff]  ;;  %44 = vst.msk [vmem:[#allocation2] sm:$0xff] %vm43_vm0, %v1028_v0 }
  0x28   :  { %v115_v7 = vld [vmem:[#allocation5 + $0x38] sm:$0xff]  ;;  %v793_v8 = vpack.c.bf16 %v110_v5, %v108_v3  ;;  %v112_v10 = vld [vmem:[#allocation5 + $0x20] sm:$0xff]  ;;  %v114_v11 = vld [vmem:[#allocation5 + $0x30] sm:$0xff]  ;;  %45 = vst.msk [vmem:[#allocation2 + $0x8] sm:$0xff] %vm43_vm0, %v1028_v0 }
  0x29   :  { %v795_v9 = vpack.c.bf16 %v115_v7, %v113_v6  ;;  %v117_v12 = vld [vmem:[#allocation5 + $0x48] sm:$0xff]  ;;  %792 = vmatprep.subr.bf16.mxu0 %v791_v4  ;;  %823 = vmatprep.subr.bf16.mxu1 %v791_v4  ;;  %v119_v13 = vld [vmem:[#allocation5 + $0x58] sm:$0xff]  ;;  %v797_v14 = vpack.c.bf16 %v114_v11, %v112_v10  ;;  %v116_v16 = vld [vmem:[#allocation5 + $0x40] sm:$0xff]  ;;  %46 = vst.msk [vmem:[#allocation2 + $0x10] sm:$0xff] %vm43_vm0, %v1028_v0 }
  0x2a   :  { %794 = vmatpush1.bf16.msra.mxu0 %v793_v8  ;;  %831 = vmatpush1.bf16.msra.mxu1 %v793_v8  ;;  %v799_v15 = vpack.c.bf16 %v119_v13, %v117_v12  ;;  %v118_v17 = vld [vmem:[#allocation5 + $0x50] sm:$0xff]  ;;  %v121_v18 = vld [vmem:[#allocation5 + $0x68] sm:$0xff]  ;;  %v123_v19 = vld [vmem:[#allocation5 + $0x78] sm:$0xff]  ;;  %47 = vst.msk [vmem:[#allocation2 + $0x18] sm:$0xff] %vm43_vm0, %v1028_v0 }
  0x2b   :  { %796 = vmatprep.subr.bf16.mxu0 %v795_v9  ;;  %824 = vmatprep.subr.bf16.mxu1 %v795_v9  ;;  %v801_v20 = vpack.c.bf16 %v118_v17, %v116_v16  ;;  %v803_v21 = vpack.c.bf16 %v123_v19, %v121_v18  ;;  %v120_v22 = vld [vmem:[#allocation5 + $0x60] sm:$0xff]  ;;  %v122_v23 = vld [vmem:[#allocation5 + $0x70] sm:$0xff]  ;;  %v125_v24 = vld [vmem:[#allocation5 + $0x88] sm:$0xff]  ;;  %48 = vst.msk [vmem:[#allocation2 + $0x20] sm:$0xff] %vm43_vm0, %v1028_v0 }
  0x2c   :  { %v127_v25 = vld [vmem:[#allocation5 + $0x98] sm:$0xff]  ;;  %v805_v26 = vpack.c.bf16 %v122_v23, %v120_v22  ;;  %v124_v28 = vld [vmem:[#allocation5 + $0x80] sm:$0xff]  ;;  %v126_v29 = vld [vmem:[#allocation5 + $0x90] sm:$0xff]  ;;  %49 = vst.msk [vmem:[#allocation2 + $0x28] sm:$0xff] %vm43_vm0, %v1028_v0 }
  0x2d   :  { %v807_v27 = vpack.c.bf16 %v127_v25, %v125_v24  ;;  %v129_v30 = vld [vmem:[#allocation5 + $0xa8] sm:$0xff]  ;;  %v131_v31 = vld [vmem:[#allocation5 + $0xb8] sm:$0xff]  ;;  %v809_v32 = vpack.c.bf16 %v126_v29, %v124_v28  ;;  %v128_v34 = vld [vmem:[#allocation5 + $0xa0] sm:$0xff]  ;;  %50 = vst.msk [vmem:[#allocation2 + $0x30] sm:$0xff] %vm43_vm0, %v1028_v0 }
  0x2e   :  { %798 = vmatpush1.bf16.msra.mxu0 %v797_v14  ;;  %832 = vmatpush1.bf16.msra.mxu1 %v797_v14  ;;  %v811_v33 = vpack.c.bf16 %v131_v31, %v129_v30  ;;  %v130_v35 = vld [vmem:[#allocation5 + $0xb0] sm:$0xff]  ;;  %v133_v36 = vld [vmem:[#allocation5 + $0xc8] sm:$0xff]  ;;  %v135_v37 = vld [vmem:[#allocation5 + $0xd8] sm:$0xff]  ;;  %51 = vst.msk [vmem:[#allocation2 + $0x38] sm:$0xff] %vm43_vm0, %v1028_v0 }
  0x2f   :  { %800 = vmatprep.subr.bf16.mxu0 %v799_v15  ;;  %825 = vmatprep.subr.bf16.mxu1 %v799_v15  ;;  %v813_v38 = vpack.c.bf16 %v130_v35, %v128_v34  ;;  %v815_v39 = vpack.c.bf16 %v135_v37, %v133_v36  ;;  %v132_v40 = vld [vmem:[#allocation5 + $0xc0] sm:$0xff]  ;;  %v134_v41 = vld [vmem:[#allocation5 + $0xd0] sm:$0xff]  ;;  %v137_v42 = vld [vmem:[#allocation5 + $0xe8] sm:$0xff]  ;;  %52 = vst.msk [vmem:[#allocation2 + $0x40] sm:$0xff] %vm43_vm0, %v1028_v0 }
  0x30   :  { %v139_v43 = vld [vmem:[#allocation5 + $0xf8] sm:$0xff]  ;;  %v817_v44 = vpack.c.bf16 %v134_v41, %v132_v40  ;;  %v136_v46 = vld [vmem:[#allocation5 + $0xe0] sm:$0xff]  ;;  %v138_v47 = vld [vmem:[#allocation5 + $0xf0] sm:$0xff]  ;;  %53 = vst.msk [vmem:[#allocation2 + $0x48] sm:$0xff] %vm43_vm0, %v1028_v0 }
  0x31   :  { %v819_v45 = vpack.c.bf16 %v139_v43, %v137_v42  ;;  %v821_v48 = vpack.c.bf16 %v138_v47, %v136_v46  ;;  %v76_v49 = vld [vmem:[#allocation3] sm:$0xff]  ;;  %v77_v51 = vld [vmem:[#allocation3 + $0x8] sm:$0xff]  ;;  %v78_v53 = vld [vmem:[#allocation3 + $0x10] sm:$0xff]  ;;  %54 = vst.msk [vmem:[#allocation2 + $0x50] sm:$0xff] %vm43_vm0, %v1028_v0 }
  0x32   :  { %802 = vmatpush1.bf16.msra.mxu0 %v801_v20  ;;  %833 = vmatpush1.bf16.msra.mxu1 %v801_v20  ;;  %v92_v50 = vld [vmem:[#allocation3 + $0x80] sm:$0xff]  ;;  %v93_v52 = vld [vmem:[#allocation3 + $0x88] sm:$0xff]  ;;  %v94_v54 = vld [vmem:[#allocation3 + $0x90] sm:$0xff]  ;;  %55 = vst.msk [vmem:[#allocation2 + $0x58] sm:$0xff] %vm43_vm0, %v1028_v0 }
  0x33   :  { %804 = vmatprep.subr.bf16.mxu0 %v803_v21  ;;  %826 = vmatprep.subr.bf16.mxu1 %v803_v21  ;;  %v79_v55 = vld [vmem:[#allocation3 + $0x18] sm:$0xff]  ;;  %v80_v57 = vld [vmem:[#allocation3 + $0x20] sm:$0xff]  ;;  %v81_v59 = vld [vmem:[#allocation3 + $0x28] sm:$0xff]  ;;  %56 = vst.msk [vmem:[#allocation2 + $0x60] sm:$0xff] %vm43_vm0, %v1028_v0 }
  0x34   :  { %v95_v56 = vld [vmem:[#allocation3 + $0x98] sm:$0xff]  ;;  %v96_v58 = vld [vmem:[#allocation3 + $0xa0] sm:$0xff]  ;;  %v97_v60 = vld [vmem:[#allocation3 + $0xa8] sm:$0xff]  ;;  %57 = vst.msk [vmem:[#allocation2 + $0x68] sm:$0xff] %vm43_vm0, %v1028_v0 }
  0x35   :  { %v82_v61 = vld [vmem:[#allocation3 + $0x30] sm:$0xff]  ;;  %v83_v63 = vld [vmem:[#allocation3 + $0x38] sm:$0xff]  ;;  %v84_v2 = vld [vmem:[#allocation3 + $0x40] sm:$0xff]  ;;  %58 = vst.msk [vmem:[#allocation2 + $0x70] sm:$0xff] %vm43_vm0, %v1028_v0 }
  0x36   :  { %806 = vmatpush1.bf16.msra.mxu0 %v805_v26  ;;  %834 = vmatpush1.bf16.msra.mxu1 %v805_v26  ;;  %v98_v62 = vld [vmem:[#allocation3 + $0xb0] sm:$0xff]  ;;  %v99_v1 = vld [vmem:[#allocation3 + $0xb8] sm:$0xff]  ;;  %v100_v3 = vld [vmem:[#allocation3 + $0xc0] sm:$0xff]  ;;  %59 = vst.msk [vmem:[#allocation2 + $0x78] sm:$0xff] %vm43_vm0, %v1028_v0 }
  0x37   :  { %808 = vmatprep.subr.bf16.mxu0 %v807_v27  ;;  %827 = vmatprep.subr.bf16.mxu1 %v807_v27  ;;  %v85_v4 = vld [vmem:[#allocation3 + $0x48] sm:$0xff]  ;;  %v86_v6 = vld [vmem:[#allocation3 + $0x50] sm:$0xff]  ;;  %v87_v8 = vld [vmem:[#allocation3 + $0x58] sm:$0xff]  ;;  %60 = vst.msk [vmem:[#allocation2 + $0x80] sm:$0xff] %vm43_vm0, %v1028_v0 }
  0x38   :  { %v101_v5 = vld [vmem:[#allocation3 + $0xc8] sm:$0xff]  ;;  %v102_v7 = vld [vmem:[#allocation3 + $0xd0] sm:$0xff]  ;;  %v103_v9 = vld [vmem:[#allocation3 + $0xd8] sm:$0xff]  ;;  %61 = vst.msk [vmem:[#allocation2 + $0x88] sm:$0xff] %vm43_vm0, %v1028_v0 }
  0x39   :  { %v88_v10 = vld [vmem:[#allocation3 + $0x60] sm:$0xff]  ;;  %v89_v12 = vld [vmem:[#allocation3 + $0x68] sm:$0xff]  ;;  %v90_v14 = vld [vmem:[#allocation3 + $0x70] sm:$0xff]  ;;  %62 = vst.msk [vmem:[#allocation2 + $0x90] sm:$0xff] %vm43_vm0, %v1028_v0 }
  0x3a   :  { %810 = vmatpush1.bf16.msra.mxu0 %v809_v32  ;;  %835 = vmatpush1.bf16.msra.mxu1 %v809_v32  ;;  %v104_v11 = vld [vmem:[#allocation3 + $0xe0] sm:$0xff]  ;;  %v105_v13 = vld [vmem:[#allocation3 + $0xe8] sm:$0xff]  ;;  %v106_v15 = vld [vmem:[#allocation3 + $0xf0] sm:$0xff]  ;;  %63 = vst.msk [vmem:[#allocation2 + $0x98] sm:$0xff] %vm43_vm0, %v1028_v0 }
  0x3b   :  { %812 = vmatprep.subr.bf16.mxu0 %v811_v33  ;;  %828 = vmatprep.subr.bf16.mxu1 %v811_v33  ;;  %v91_v16 = vld [vmem:[#allocation3 + $0x78] sm:$0xff]  ;;  %64 = vst.msk [vmem:[#allocation2 + $0xa0] sm:$0xff] %vm43_vm0, %v1028_v0  ;;  %65 = vst.msk [vmem:[#allocation2 + $0xa8] sm:$0xff] %vm43_vm0, %v1028_v0 }
  0x3c   :  { %v107_v17 = vld [vmem:[#allocation3 + $0xf8] sm:$0xff]  ;;  %66 = vst.msk [vmem:[#allocation2 + $0xb0] sm:$0xff] %vm43_vm0, %v1028_v0  ;;  %67 = vst.msk [vmem:[#allocation2 + $0xb8] sm:$0xff] %vm43_vm0, %v1028_v0 }
  0x3d   :  { %68 = vst.msk [vmem:[#allocation2 + $0xc0] sm:$0xff] %vm43_vm0, %v1028_v0  ;;  %69 = vst.msk [vmem:[#allocation2 + $0xc8] sm:$0xff] %vm43_vm0, %v1028_v0 }
  0x3e   :  { %814 = vmatpush1.bf16.msra.mxu0 %v813_v38  ;;  %836 = vmatpush1.bf16.msra.mxu1 %v813_v38  ;;  %70 = vst.msk [vmem:[#allocation2 + $0xd0] sm:$0xff] %vm43_vm0, %v1028_v0  ;;  %71 = vst.msk [vmem:[#allocation2 + $0xd8] sm:$0xff] %vm43_vm0, %v1028_v0 }
  0x3f   :  { %816 = vmatprep.subr.bf16.mxu0 %v815_v39  ;;  %829 = vmatprep.subr.bf16.mxu1 %v815_v39  ;;  %72 = vst.msk [vmem:[#allocation2 + $0xe0] sm:$0xff] %vm43_vm0, %v1028_v0  ;;  %73 = vst.msk [vmem:[#allocation2 + $0xe8] sm:$0xff] %vm43_vm0, %v1028_v0 }
  0x40   :  { %74 = vst.msk [vmem:[#allocation2 + $0xf0] sm:$0xff] %vm43_vm0, %v1028_v0  ;;  %75 = vst.msk [vmem:[#allocation2 + $0xf8] sm:$0xff] %vm43_vm0, %v1028_v0 }
  0x42   :  { %818 = vmatpush1.bf16.msra.mxu0 %v817_v44  ;;  %837 = vmatpush1.bf16.msra.mxu1 %v817_v44 }
  0x43   :  { %820 = vmatprep.subr.bf16.mxu0 %v819_v45  ;;  %830 = vmatprep.subr.bf16.mxu1 %v819_v45 }
  0x46   :  { %822 = vmatpush1.bf16.msra.mxu0 %v821_v48  ;;  %838 = vmatpush1.bf16.msra.mxu1 %v821_v48 }
  0x49   :  { %205 = vmatmul.mubr.f32.vlgmr.msra.gmra.mrb[0].mxu0 %v76_v49  ;;  %301 = vmatmul.mubr.f32.vlgmr.msra.gmra.mrb[0].mxu1 %v92_v50 }
  0x4a   :  { %210 = vmatprep.mubr.f32.mxu0 %v1028_v0  ;;  %306 = vmatprep.mubr.f32.mxu1 %v1028_v0 }
  0x4d   :  { %211 = vmatmul.mubr.f32.gmra.mrb[2].mxu0 %v77_v51  ;;  %307 = vmatmul.mubr.f32.gmra.mrb[2].mxu1 %v93_v52 }
  0x4e   :  { %216 = vmatprep.mubr.f32.mxu0 %v1028_v0  ;;  %312 = vmatprep.mubr.f32.mxu1 %v1028_v0 }
  0x51   :  { %217 = vmatmul.mubr.f32.gmra.mrb[4].mxu0 %v78_v53  ;;  %313 = vmatmul.mubr.f32.gmra.mrb[4].mxu1 %v94_v54 }
  0x52   :  { %222 = vmatprep.mubr.f32.mxu0 %v1028_v0  ;;  %318 = vmatprep.mubr.f32.mxu1 %v1028_v0 }
  0x55   :  { %223 = vmatmul.mubr.f32.gmra.mrb[6].mxu0 %v79_v55  ;;  %319 = vmatmul.mubr.f32.gmra.mrb[6].mxu1 %v95_v56 }
  0x56   :  { %228 = vmatprep.mubr.f32.mxu0 %v1028_v0  ;;  %324 = vmatprep.mubr.f32.mxu1 %v1028_v0 }
  0x59   :  { %229 = vmatmul.mubr.f32.gmra.mrb[8].mxu0 %v80_v57  ;;  %325 = vmatmul.mubr.f32.gmra.mrb[8].mxu1 %v96_v58 }
  0x5a   :  { %234 = vmatprep.mubr.f32.mxu0 %v1028_v0  ;;  %330 = vmatprep.mubr.f32.mxu1 %v1028_v0 }
  0x5d   :  { %235 = vmatmul.mubr.f32.gmra.mrb[10].mxu0 %v81_v59  ;;  %331 = vmatmul.mubr.f32.gmra.mrb[10].mxu1 %v97_v60 }
  0x5e   :  { %240 = vmatprep.mubr.f32.mxu0 %v1028_v0  ;;  %336 = vmatprep.mubr.f32.mxu1 %v1028_v0 }
  0x61   :  { %241 = vmatmul.mubr.f32.gmra.mrb[12].mxu0 %v82_v61  ;;  %337 = vmatmul.mubr.f32.gmra.mrb[12].mxu1 %v98_v62 }
  0x62   :  { %246 = vmatprep.mubr.f32.mxu0 %v1028_v0  ;;  %342 = vmatprep.mubr.f32.mxu1 %v1028_v0 }
  0x65   :  { %247 = vmatmul.mubr.f32.gmra.mrb[14].mxu0 %v83_v63  ;;  %343 = vmatmul.mubr.f32.gmra.mrb[14].mxu1 %v99_v1 }
  0x66   :  { %252 = vmatprep.mubr.f32.mxu0 %v1028_v0  ;;  %348 = vmatprep.mubr.f32.mxu1 %v1028_v0 }
  0x69   :  { %253 = vmatmul.mubr.f32.gmra.mrb[16].mxu0 %v84_v2  ;;  %349 = vmatmul.mubr.f32.gmra.mrb[16].mxu1 %v100_v3 }
  0x6a   :  { %258 = vmatprep.mubr.f32.mxu0 %v1028_v0  ;;  %354 = vmatprep.mubr.f32.mxu1 %v1028_v0 }
  0x6d   :  { %259 = vmatmul.mubr.f32.gmra.mrb[18].mxu0 %v85_v4  ;;  %355 = vmatmul.mubr.f32.gmra.mrb[18].mxu1 %v101_v5 }
  0x6e   :  { %264 = vmatprep.mubr.f32.mxu0 %v1028_v0  ;;  %360 = vmatprep.mubr.f32.mxu1 %v1028_v0 }
  0x71   :  { %265 = vmatmul.mubr.f32.gmra.mrb[20].mxu0 %v86_v6  ;;  %361 = vmatmul.mubr.f32.gmra.mrb[20].mxu1 %v102_v7 }
  0x72   :  { %270 = vmatprep.mubr.f32.mxu0 %v1028_v0  ;;  %366 = vmatprep.mubr.f32.mxu1 %v1028_v0 }
  0x75   :  { %271 = vmatmul.mubr.f32.gmra.mrb[22].mxu0 %v87_v8  ;;  %367 = vmatmul.mubr.f32.gmra.mrb[22].mxu1 %v103_v9 }
  0x76   :  { %276 = vmatprep.mubr.f32.mxu0 %v1028_v0  ;;  %372 = vmatprep.mubr.f32.mxu1 %v1028_v0 }
  0x79   :  { %277 = vmatmul.mubr.f32.gmra.mrb[24].mxu0 %v88_v10  ;;  %373 = vmatmul.mubr.f32.gmra.mrb[24].mxu1 %v104_v11 }
  0x7a   :  { %282 = vmatprep.mubr.f32.mxu0 %v1028_v0  ;;  %378 = vmatprep.mubr.f32.mxu1 %v1028_v0 }
  0x7d   :  { %283 = vmatmul.mubr.f32.gmra.mrb[26].mxu0 %v89_v12  ;;  %379 = vmatmul.mubr.f32.gmra.mrb[26].mxu1 %v105_v13 }
  0x7e   :  { %288 = vmatprep.mubr.f32.mxu0 %v1028_v0  ;;  %384 = vmatprep.mubr.f32.mxu1 %v1028_v0 }
  0x81   :  { %289 = vmatmul.mubr.f32.gmra.mrb[28].mxu0 %v90_v14  ;;  %385 = vmatmul.mubr.f32.gmra.mrb[28].mxu1 %v106_v15 }
  0x82   :  { %294 = vmatprep.mubr.f32.mxu0 %v1028_v0  ;;  %390 = vmatprep.mubr.f32.mxu1 %v1028_v0 }
  0x85   :  { %295 = vmatmul.mubr.f32.gmra.mrb[30].mxu0 %v91_v16  ;;  %391 = vmatmul.mubr.f32.gmra.mrb[30].mxu1 %v107_v17 }
 0x11c   :  { %v206_v18 = vpop.f32.mrb[0].mxu0  ;;  %v302_v19 = vpop.f32.mrb[0].mxu1 }
 0x11d   :  { %v429_v20 = vmul.f32 1.442695, %v206_v18  ;;  %v493_v21 = vmul.f32 1.442695, %v302_v19  ;;  %v208_v22 = vpop.f32.mrb[1].mxu0  ;;  %v304_v23 = vpop.f32.mrb[1].mxu1 }
 0x11e   :  { %v431_v24 = vmul.f32 1.442695, %v208_v22  ;;  %v495_v25 = vmul.f32 1.442695, %v304_v23 }
 0x11f   :  { %846 = vpow2.f32 %v429_v20 }
 0x120   :  { %848 = vpow2.f32 %v493_v21  ;;  %v212_v26 = vpop.f32.mrb[2].mxu0  ;;  %v308_v27 = vpop.f32.mrb[2].mxu1 }
 0x121   :  { %850 = vpow2.f32 %v431_v24  ;;  %v433_v28 = vmul.f32 1.442695, %v212_v26  ;;  %v497_v29 = vmul.f32 1.442695, %v308_v27  ;;  %v214_v30 = vpop.f32.mrb[3].mxu0  ;;  %v310_v31 = vpop.f32.mrb[3].mxu1 }
 0x122   :  { %852 = vpow2.f32 %v495_v25  ;;  %v435_v32 = vmul.f32 1.442695, %v214_v30  ;;  %v499_v0 = vmul.f32 1.442695, %v310_v31 }
 0x123   :  { %854 = vpow2.f32 %v433_v28 }
 0x124   :  { %856 = vpow2.f32 %v497_v29  ;;  %v218_v33 = vpop.f32.mrb[4].mxu0  ;;  %v314_v34 = vpop.f32.mrb[4].mxu1 }
 0x125   :  { %858 = vpow2.f32 %v435_v32  ;;  %v437_v35 = vmul.f32 1.442695, %v218_v33  ;;  %v220_v36 = vpop.f32.mrb[5].mxu0  ;;  %v501_v37 = vmul.f32 1.442695, %v314_v34  ;;  %v316_v38 = vpop.f32.mrb[5].mxu1 }
 0x126   :  { %860 = vpow2.f32 %v499_v0  ;;  %v439_v39 = vmul.f32 1.442695, %v220_v36  ;;  %v503_v40 = vmul.f32 1.442695, %v316_v38 }
 0x127   :  { %862 = vpow2.f32 %v437_v35 }
 0x128   :  { %864 = vpow2.f32 %v439_v39  ;;  %v224_v41 = vpop.f32.mrb[6].mxu0  ;;  %v320_v42 = vpop.f32.mrb[6].mxu1 }
 0x129   :  { %v847_v43 = vpop.eup %846  ;;  %866 = vpow2.f32 %v501_v37  ;;  %v441_v44 = vmul.f32 1.442695, %v224_v41  ;;  %v226_v45 = vpop.f32.mrb[7].mxu0  ;;  %v505_v46 = vmul.f32 1.442695, %v320_v42 }
 0x12a   :  { %v322_v47 = vpop.f32.mrb[7].mxu1  ;;  %v849_v48 = vpop.eup %848  ;;  %868 = vpow2.f32 %v503_v40  ;;  %v443_v49 = vmul.f32 1.442695, %v226_v45 }
 0x12b   :  { %v507_v50 = vmul.f32 1.442695, %v322_v47  ;;  %v851_v51 = vpop.eup %850  ;;  %870 = vpow2.f32 %v441_v44 }
 0x12c   :  { %v853_v52 = vpop.eup %852  ;;  %872 = vpow2.f32 %v443_v49  ;;  %v230_v53 = vpop.f32.mrb[8].mxu0  ;;  %v557_v54 = vadd.f32 %v851_v51, %v847_v43 }
 0x12d   :  { %v326_v55 = vpop.f32.mrb[8].mxu1  ;;  %v855_v56 = vpop.eup %854  ;;  %874 = vpow2.f32 %v505_v46  ;;  %v445_v57 = vmul.f32 1.442695, %v230_v53  ;;  %v605_v61 = vadd.f32 %v853_v52, %v849_v48 }
 0x12e   :  { %v232_v58 = vpop.f32.mrb[9].mxu0  ;;  %v509_v59 = vmul.f32 1.442695, %v326_v55  ;;  %v328_v60 = vpop.f32.mrb[9].mxu1  ;;  %876 = vpow2.f32 %v507_v50  ;;  %558 = vadd.xlane.f32.xlu0 %v557_v54 }
 0x12f   :  { %v857_v62 = vpop.eup %856  ;;  %v447_v63 = vmul.f32 1.442695, %v232_v58  ;;  %v511_v1 = vmul.f32 1.442695, %v328_v60  ;;  %878 = vpow2.f32 %v445_v57 }
 0x130   :  { %v859_v2 = vpop.eup %858  ;;  %v236_v4 = vpop.f32.mrb[10].mxu0 }
 0x131   :  { %v861_v3 = vpop.eup %860  ;;  %880 = vpow2.f32 %v447_v63  ;;  %v332_v5 = vpop.f32.mrb[10].mxu1  ;;  %v560_v6 = vadd.f32 %v859_v2, %v855_v56  ;;  %v449_v8 = vmul.f32 1.442695, %v236_v4 }
 0x132   :  { %v863_v7 = vpop.eup %862  ;;  %882 = vpow2.f32 %v509_v59  ;;  %v608_v9 = vadd.f32 %v861_v3, %v857_v62  ;;  %v238_v10 = vpop.f32.mrb[11].mxu0  ;;  %v513_v11 = vmul.f32 1.442695, %v332_v5  ;;  %606 = vadd.xlane.f32.xlu0 %v605_v61 }
 0x133   :  { %v334_v12 = vpop.f32.mrb[11].mxu1  ;;  %v865_v13 = vpop.eup %864  ;;  %884 = vpow2.f32 %v511_v1  ;;  %v451_v14 = vmul.f32 1.442695, %v238_v10 }
 0x134   :  { %v515_v15 = vmul.f32 1.442695, %v334_v12  ;;  %v867_v16 = vpop.eup %866  ;;  %886 = vpow2.f32 %v449_v8  ;;  %609 = vadd.xlane.f32.xlu1 %v608_v9  ;;  %v563_v17 = vadd.f32 %v865_v13, %v863_v7  ;;  %v242_v19 = vpop.f32.mrb[12].mxu0 }
 0x135   :  { %v869_v18 = vpop.eup %868  ;;  %888 = vpow2.f32 %v451_v14  ;;  %v338_v20 = vpop.f32.mrb[12].mxu1  ;;  %v453_v22 = vmul.f32 1.442695, %v242_v19 }
 0x136   :  { %v871_v21 = vpop.eup %870  ;;  %890 = vpow2.f32 %v513_v11  ;;  %v244_v23 = vpop.f32.mrb[13].mxu0  ;;  %v517_v24 = vmul.f32 1.442695, %v338_v20  ;;  %v611_v26 = vadd.f32 %v869_v18, %v867_v16  ;;  %561 = vadd.xlane.f32.xlu0 %v560_v6 }
 0x137   :  { %v340_v25 = vpop.f32.mrb[13].mxu1  ;;  %v873_v27 = vpop.eup %872  ;;  %892 = vpow2.f32 %v515_v15  ;;  %v455_v28 = vmul.f32 1.442695, %v244_v23 }
 0x138   :  { %v519_v29 = vmul.f32 1.442695, %v340_v25  ;;  %v875_v30 = vpop.eup %874  ;;  %894 = vpow2.f32 %v453_v22  ;;  %564 = vadd.xlane.f32.xlu1 %v563_v17  ;;  %v566_v31 = vadd.f32 %v873_v27, %v871_v21  ;;  %v248_v0 = vpop.f32.mrb[14].mxu0 }
 0x139   :  { %v877_v32 = vpop.eup %876  ;;  %896 = vpow2.f32 %v455_v28  ;;  %v344_v33 = vpop.f32.mrb[14].mxu1  ;;  %v457_v35 = vmul.f32 1.442695, %v248_v0 }
 0x13a   :  { %v879_v34 = vpop.eup %878  ;;  %898 = vpow2.f32 %v517_v24  ;;  %v250_v36 = vpop.f32.mrb[15].mxu0  ;;  %v521_v37 = vmul.f32 1.442695, %v344_v33  ;;  %v614_v39 = vadd.f32 %v877_v32, %v875_v30  ;;  %612 = vadd.xlane.f32.xlu0 %v611_v26 }
 0x13b   :  { %v346_v38 = vpop.f32.mrb[15].mxu1  ;;  %v881_v40 = vpop.eup %880  ;;  %900 = vpow2.f32 %v519_v29  ;;  %v459_v41 = vmul.f32 1.442695, %v250_v36 }
 0x13c   :  { %v523_v42 = vmul.f32 1.442695, %v346_v38  ;;  %v883_v43 = vpop.eup %882  ;;  %902 = vpow2.f32 %v457_v35  ;;  %567 = vadd.xlane.f32.xlu1 %v566_v31  ;;  %v569_v44 = vadd.f32 %v881_v40, %v879_v34  ;;  %v254_v46 = vpop.f32.mrb[16].mxu0 }
 0x13d   :  { %v885_v45 = vpop.eup %884  ;;  %904 = vpow2.f32 %v459_v41  ;;  %v350_v47 = vpop.f32.mrb[16].mxu1  ;;  %v461_v49 = vmul.f32 1.442695, %v254_v46 }
 0x13e   :  { %v887_v48 = vpop.eup %886  ;;  %906 = vpow2.f32 %v521_v37  ;;  %v256_v50 = vpop.f32.mrb[17].mxu0  ;;  %v525_v51 = vmul.f32 1.442695, %v350_v47  ;;  %v617_v53 = vadd.f32 %v885_v45, %v883_v43  ;;  %570 = vadd.xlane.f32.xlu0 %v569_v44 }
 0x13f   :  { %v352_v52 = vpop.f32.mrb[17].mxu1  ;;  %v889_v54 = vpop.eup %888  ;;  %908 = vpow2.f32 %v523_v42  ;;  %v463_v55 = vmul.f32 1.442695, %v256_v50 }
 0x140   :  { %v527_v56 = vmul.f32 1.442695, %v352_v52  ;;  %v891_v57 = vpop.eup %890  ;;  %910 = vpow2.f32 %v461_v49  ;;  %615 = vadd.xlane.f32.xlu1 %v614_v39  ;;  %v572_v58 = vadd.f32 %v889_v54, %v887_v48  ;;  %v260_v60 = vpop.f32.mrb[18].mxu0 }
 0x141   :  { %v893_v59 = vpop.eup %892  ;;  %912 = vpow2.f32 %v463_v55  ;;  %v356_v61 = vpop.f32.mrb[18].mxu1  ;;  %v465_v63 = vmul.f32 1.442695, %v260_v60 }
 0x142   :  { %v895_v62 = vpop.eup %894  ;;  %914 = vpow2.f32 %v525_v51  ;;  %v262_v1 = vpop.f32.mrb[19].mxu0  ;;  %v529_v2 = vmul.f32 1.442695, %v356_v61  ;;  %v620_v4 = vadd.f32 %v893_v59, %v891_v57  ;;  %618 = vadd.xlane.f32.xlu0 %v617_v53 }
 0x143   :  { %v358_v3 = vpop.f32.mrb[19].mxu1  ;;  %v897_v5 = vpop.eup %896  ;;  %916 = vpow2.f32 %v527_v56  ;;  %v467_v6 = vmul.f32 1.442695, %v262_v1 }
 0x144   :  { %v531_v7 = vmul.f32 1.442695, %v358_v3  ;;  %v899_v8 = vpop.eup %898  ;;  %918 = vpow2.f32 %v465_v63  ;;  %573 = vadd.xlane.f32.xlu1 %v572_v58  ;;  %v575_v9 = vadd.f32 %v897_v5, %v895_v62  ;;  %v266_v11 = vpop.f32.mrb[20].mxu0 }
 0x145   :  { %v901_v10 = vpop.eup %900  ;;  %920 = vpow2.f32 %v467_v6  ;;  %v362_v12 = vpop.f32.mrb[20].mxu1  ;;  %v469_v14 = vmul.f32 1.442695, %v266_v11 }
 0x146   :  { %v903_v13 = vpop.eup %902  ;;  %922 = vpow2.f32 %v529_v2  ;;  %v268_v15 = vpop.f32.mrb[21].mxu0  ;;  %v533_v16 = vmul.f32 1.442695, %v362_v12  ;;  %v623_v18 = vadd.f32 %v901_v10, %v899_v8  ;;  %576 = vadd.xlane.f32.xlu0 %v575_v9 }
 0x147   :  { %v364_v17 = vpop.f32.mrb[21].mxu1  ;;  %v905_v19 = vpop.eup %904  ;;  %924 = vpow2.f32 %v531_v7  ;;  %v471_v20 = vmul.f32 1.442695, %v268_v15 }
 0x148   :  { %v535_v21 = vmul.f32 1.442695, %v364_v17  ;;  %v907_v22 = vpop.eup %906  ;;  %926 = vpow2.f32 %v469_v14  ;;  %621 = vadd.xlane.f32.xlu1 %v620_v4  ;;  %v578_v23 = vadd.f32 %v905_v19, %v903_v13  ;;  %v272_v25 = vpop.f32.mrb[22].mxu0 }
 0x149   :  { %v909_v24 = vpop.eup %908  ;;  %928 = vpow2.f32 %v471_v20  ;;  %v368_v26 = vpop.f32.mrb[22].mxu1  ;;  %v473_v28 = vmul.f32 1.442695, %v272_v25 }
 0x14a   :  { %v911_v27 = vpop.eup %910  ;;  %930 = vpow2.f32 %v533_v16  ;;  %v274_v29 = vpop.f32.mrb[23].mxu0  ;;  %v537_v30 = vmul.f32 1.442695, %v368_v26  ;;  %v626_v32 = vadd.f32 %v909_v24, %v907_v22  ;;  %624 = vadd.xlane.f32.xlu0 %v623_v18 }
 0x14b   :  { %v370_v31 = vpop.f32.mrb[23].mxu1  ;;  %v913_v0 = vpop.eup %912  ;;  %932 = vpow2.f32 %v535_v21  ;;  %v475_v33 = vmul.f32 1.442695, %v274_v29 }
 0x14c   :  { %v539_v34 = vmul.f32 1.442695, %v370_v31  ;;  %v915_v35 = vpop.eup %914  ;;  %934 = vpow2.f32 %v473_v28  ;;  %579 = vadd.xlane.f32.xlu1 %v578_v23  ;;  %v581_v36 = vadd.f32 %v913_v0, %v911_v27  ;;  %v278_v38 = vpop.f32.mrb[24].mxu0 }
 0x14d   :  { %v917_v37 = vpop.eup %916  ;;  %936 = vpow2.f32 %v475_v33  ;;  %v374_v39 = vpop.f32.mrb[24].mxu1  ;;  %v477_v41 = vmul.f32 1.442695, %v278_v38 }
 0x14e   :  { %v919_v40 = vpop.eup %918  ;;  %938 = vpow2.f32 %v537_v30  ;;  %v280_v42 = vpop.f32.mrb[25].mxu0  ;;  %v541_v43 = vmul.f32 1.442695, %v374_v39  ;;  %v629_v45 = vadd.f32 %v917_v37, %v915_v35  ;;  %582 = vadd.xlane.f32.xlu0 %v581_v36 }
 0x14f   :  { %v376_v44 = vpop.f32.mrb[25].mxu1  ;;  %v921_v46 = vpop.eup %920  ;;  %940 = vpow2.f32 %v539_v34  ;;  %v479_v47 = vmul.f32 1.442695, %v280_v42 }
 0x150   :  { %v543_v48 = vmul.f32 1.442695, %v376_v44  ;;  %v923_v49 = vpop.eup %922  ;;  %942 = vpow2.f32 %v477_v41  ;;  %627 = vadd.xlane.f32.xlu1 %v626_v32  ;;  %v584_v50 = vadd.f32 %v921_v46, %v919_v40  ;;  %v284_v52 = vpop.f32.mrb[26].mxu0 }
 0x151   :  { %v925_v51 = vpop.eup %924  ;;  %944 = vpow2.f32 %v479_v47  ;;  %v380_v53 = vpop.f32.mrb[26].mxu1  ;;  %v481_v55 = vmul.f32 1.442695, %v284_v52  ;;  %v413_v52 = vld [vmem:[#allocation2 + $0x80] sm:$0xff] }
 0x152   :  { %v927_v54 = vpop.eup %926  ;;  %946 = vpow2.f32 %v541_v43  ;;  %v286_v56 = vpop.f32.mrb[27].mxu0  ;;  %v545_v57 = vmul.f32 1.442695, %v380_v53  ;;  %v632_v59 = vadd.f32 %v925_v51, %v923_v49  ;;  %630 = vadd.xlane.f32.xlu0 %v629_v45  ;;  %v397_v49 = vld [vmem:[#allocation2] sm:$0xff]  ;;  %v414_v53 = vld [vmem:[#allocation2 + $0x88] sm:$0xff] }
 0x153   :  { %v382_v58 = vpop.f32.mrb[27].mxu1  ;;  %v929_v60 = vpop.eup %928  ;;  %948 = vpow2.f32 %v543_v48  ;;  %v483_v61 = vmul.f32 1.442695, %v286_v56 }
 0x154   :  { %v547_v62 = vmul.f32 1.442695, %v382_v58  ;;  %v931_v63 = vpop.eup %930  ;;  %950 = vpow2.f32 %v481_v55  ;;  %585 = vadd.xlane.f32.xlu1 %v584_v50  ;;  %v587_v1 = vadd.f32 %v929_v60, %v927_v54  ;;  %v290_v3 = vpop.f32.mrb[28].mxu0  ;;  %v398_v58 = vld [vmem:[#allocation2 + $0x8] sm:$0xff] }
 0x155   :  { %v933_v2 = vpop.eup %932  ;;  %952 = vpow2.f32 %v483_v61  ;;  %v386_v4 = vpop.f32.mrb[28].mxu1  ;;  %v485_v6 = vmul.f32 1.442695, %v290_v3  ;;  %v400_v3 = vld [vmem:[#allocation2 + $0x18] sm:$0xff] }
 0x156   :  { %v935_v5 = vpop.eup %934  ;;  %954 = vpow2.f32 %v545_v57  ;;  %v292_v7 = vpop.f32.mrb[29].mxu0  ;;  %v549_v8 = vmul.f32 1.442695, %v386_v4  ;;  %v635_v10 = vadd.f32 %v933_v2, %v931_v63  ;;  %588 = vadd.xlane.f32.xlu0 %v587_v1  ;;  %v415_v2 = vld [vmem:[#allocation2 + $0x90] sm:$0xff] }
 0x157   :  { %v388_v9 = vpop.f32.mrb[29].mxu1  ;;  %v937_v11 = vpop.eup %936  ;;  %956 = vpow2.f32 %v547_v62  ;;  %v487_v12 = vmul.f32 1.442695, %v292_v7 }
 0x158   :  { %v551_v13 = vmul.f32 1.442695, %v388_v9  ;;  %v939_v14 = vpop.eup %938  ;;  %958 = vpow2.f32 %v485_v6  ;;  %633 = vadd.xlane.f32.xlu1 %v632_v59  ;;  %v590_v15 = vadd.f32 %v937_v11, %v935_v5  ;;  %v296_v17 = vpop.f32.mrb[30].mxu0  ;;  %v399_v59 = vld [vmem:[#allocation2 + $0x10] sm:$0xff]  ;;  %v401_v9 = vld [vmem:[#allocation2 + $0x20] sm:$0xff]  ;;  %v416_v11 = vld [vmem:[#allocation2 + $0x98] sm:$0xff] }
 0x159   :  { %v941_v16 = vpop.eup %940  ;;  %960 = vpow2.f32 %v487_v12  ;;  %v392_v18 = vpop.f32.mrb[30].mxu1  ;;  %v489_v20 = vmul.f32 1.442695, %v296_v17  ;;  %v417_v17 = vld [vmem:[#allocation2 + $0xa0] sm:$0xff] }
 0x15a   :  { %v943_v19 = vpop.eup %942  ;;  %962 = vpow2.f32 %v549_v8  ;;  %v298_v21 = vpop.f32.mrb[31].mxu0  ;;  %v553_v22 = vmul.f32 1.442695, %v392_v18  ;;  %v638_v24 = vadd.f32 %v941_v16, %v939_v14  ;;  %636 = vadd.xlane.f32.xlu0 %v635_v10 }
 0x15b   :  { %v394_v23 = vpop.f32.mrb[31].mxu1  ;;  %v945_v25 = vpop.eup %944  ;;  %964 = vpow2.f32 %v551_v13  ;;  %v491_v26 = vmul.f32 1.442695, %v298_v21 }
 0x15c   :  { %v555_v27 = vmul.f32 1.442695, %v394_v23  ;;  %v947_v28 = vpop.eup %946  ;;  %966 = vpow2.f32 %v489_v20  ;;  %591 = vadd.xlane.f32.xlu1 %v590_v15  ;;  %v593_v29 = vadd.f32 %v945_v25, %v943_v19  ;;  %v402_v19 = vld [vmem:[#allocation2 + $0x28] sm:$0xff]  ;;  %v403_v25 = vld [vmem:[#allocation2 + $0x30] sm:$0xff] }
 0x15d   :  { %v949_v30 = vpop.eup %948  ;;  %968 = vpow2.f32 %v491_v26 }
 0x15e   :  { %v951_v31 = vpop.eup %950  ;;  %970 = vpow2.f32 %v553_v22  ;;  %v641_v32 = vadd.f32 %v949_v30, %v947_v28  ;;  %594 = vadd.xlane.f32.xlu0 %v593_v29 }
 0x15f   :  { %v953_v0 = vpop.eup %952  ;;  %972 = vpow2.f32 %v555_v27  ;;  %v418_v27 = vld [vmem:[#allocation2 + $0xa8] sm:$0xff] }
 0x160   :  { %v955_v33 = vpop.eup %954  ;;  %639 = vadd.xlane.f32.xlu1 %v638_v24  ;;  %v596_v34 = vadd.f32 %v953_v0, %v951_v31  ;;  %v419_v0 = vld [vmem:[#allocation2 + $0xb0] sm:$0xff] }
 0x161   :  { %v957_v35 = vpop.eup %956 }
 0x162   :  { %v959_v36 = vpop.eup %958  ;;  %v644_v37 = vadd.f32 %v957_v35, %v955_v33  ;;  %642 = vadd.xlane.f32.xlu0 %v641_v32 }
 0x163   :  { %v961_v38 = vpop.eup %960 }
 0x164   :  { %v963_v39 = vpop.eup %962  ;;  %597 = vadd.xlane.f32.xlu1 %v596_v34  ;;  %v599_v40 = vadd.f32 %v961_v38, %v959_v36  ;;  %v404_v34 = vld [vmem:[#allocation2 + $0x38] sm:$0xff] }
 0x165   :  { %v965_v41 = vpop.eup %964 }
 0x166   :  { %v967_v42 = vpop.eup %966  ;;  %v647_v43 = vadd.f32 %v965_v41, %v963_v39  ;;  %600 = vadd.xlane.f32.xlu0 %v599_v40  ;;  %v405_v40 = vld [vmem:[#allocation2 + $0x40] sm:$0xff] }
 0x167   :  { %v969_v44 = vpop.eup %968 }
 0x168   :  { %v971_v45 = vpop.eup %970  ;;  %645 = vadd.xlane.f32.xlu1 %v644_v37  ;;  %v602_v46 = vadd.f32 %v969_v44, %v967_v42  ;;  %v420_v42 = vld [vmem:[#allocation2 + $0xb8] sm:$0xff] }
 0x169   :  { %v973_v47 = vpop.eup %972 }
 0x16a   :  { %v650_v48 = vadd.f32 %v973_v47, %v971_v45  ;;  %648 = vadd.xlane.f32.xlu0 %v647_v43 }
 0x16c   :  { %603 = vadd.xlane.f32.xlu1 %v602_v46 }
 0x170   :  { %651 = vadd.xlane.f32.xlu1 %v650_v48  ;;  %v421_v48 = vld [vmem:[#allocation2 + $0xc0] sm:$0xff] }
 0x1bb   :  { %v559_v50 = vpop.xlane.xlu0 %558 }
 0x1bc   :  { %v653_v51 = vadd.f32 %v559_v50, %v397_v49  ;;  %v406_v50 = vld [vmem:[#allocation2 + $0x48] sm:$0xff] }
 0x1be   :  { %686 = vst.msk [vmem:[#allocation2] sm:$0xff] %vm43_vm0, %v653_v51 }
 0x1bf   :  { %v607_v54 = vpop.xlane.xlu0 %606 }
 0x1c0   :  { %v669_v56 = vadd.f32 %v607_v54, %v413_v52 }
 0x1c1   :  { %v610_v55 = vpop.xlane.xlu1 %609 }
 0x1c2   :  { %v670_v57 = vadd.f32 %v610_v55, %v414_v53  ;;  %702 = vst.msk [vmem:[#allocation2 + $0x80] sm:$0xff] %vm43_vm0, %v669_v56  ;;  %v407_v56 = vld [vmem:[#allocation2 + $0x50] sm:$0xff] }
 0x1c3   :  { %v562_v60 = vpop.xlane.xlu0 %561 }
 0x1c4   :  { %703 = vst.msk [vmem:[#allocation2 + $0x88] sm:$0xff] %vm43_vm0, %v670_v57  ;;  %v654_v61 = vadd.f32 %v562_v60, %v398_v58  ;;  %v422_v58 = vld [vmem:[#allocation2 + $0xc8] sm:$0xff] }
 0x1c5   :  { %v565_v62 = vpop.xlane.xlu1 %564  ;;  %v721_v63 = vld [vmem:[#allocation2] sm:$0xff] }
 0x1c6   :  { %v655_v1 = vadd.f32 %v565_v62, %v399_v59  ;;  %753 = vst.msk [vmem:[%s1326_s2] sm:$0xff] %vm43_vm0, %v721_v63  ;;  %687 = vst.msk [vmem:[#allocation2 + $0x8] sm:$0xff] %vm43_vm0, %v654_v61 }
 0x1c7   :  { %v613_v4 = vpop.xlane.xlu0 %612 }
 0x1c8   :  { %688 = vst.msk [vmem:[#allocation2 + $0x10] sm:$0xff] %vm43_vm0, %v655_v1  ;;  %v671_v5 = vadd.f32 %v613_v4, %v415_v2  ;;  %v423_v1 = vld [vmem:[#allocation2 + $0xd0] sm:$0xff] }
 0x1c9   :  { %v568_v6 = vpop.xlane.xlu1 %567  ;;  %v737_v7 = vld [vmem:[#allocation2 + $0x80] sm:$0xff] }
 0x1ca   :  { %v656_v8 = vadd.f32 %v568_v6, %v400_v3  ;;  %769 = vst.msk [vmem:[%s1326_s2 + $0x80] sm:$0xff] %vm43_vm0, %v737_v7  ;;  %704 = vst.msk [vmem:[#allocation2 + $0x90] sm:$0xff] %vm43_vm0, %v671_v5  ;;  %v408_v3 = vld [vmem:[#allocation2 + $0x58] sm:$0xff] }
 0x1cb   :  { %v738_v10 = vld [vmem:[#allocation2 + $0x88] sm:$0xff]  ;;  %v571_v12 = vpop.xlane.xlu0 %570 }
 0x1cc   :  { %770 = vst.msk [vmem:[%s1326_s2 + $0x88] sm:$0xff] %vm43_vm0, %v738_v10  ;;  %689 = vst.msk [vmem:[#allocation2 + $0x18] sm:$0xff] %vm43_vm0, %v656_v8  ;;  %v657_v14 = vadd.f32 %v571_v12, %v401_v9  ;;  %v409_v9 = vld [vmem:[#allocation2 + $0x60] sm:$0xff] }
 0x1cd   :  { %v616_v13 = vpop.xlane.xlu1 %615  ;;  %v722_v15 = vld [vmem:[#allocation2 + $0x8] sm:$0xff] }
 0x1ce   :  { %v672_v16 = vadd.f32 %v616_v13, %v416_v11  ;;  %754 = vst.msk [vmem:[%s1326_s2 + $0x8] sm:$0xff] %vm43_vm0, %v722_v15  ;;  %690 = vst.msk [vmem:[#allocation2 + $0x20] sm:$0xff] %vm43_vm0, %v657_v14  ;;  %v424_v11 = vld [vmem:[#allocation2 + $0xd8] sm:$0xff] }
 0x1cf   :  { %v723_v18 = vld [vmem:[#allocation2 + $0x10] sm:$0xff]  ;;  %v619_v20 = vpop.xlane.xlu0 %618 }
 0x1d0   :  { %755 = vst.msk [vmem:[%s1326_s2 + $0x10] sm:$0xff] %vm43_vm0, %v723_v18  ;;  %705 = vst.msk [vmem:[#allocation2 + $0x98] sm:$0xff] %vm43_vm0, %v672_v16  ;;  %v673_v21 = vadd.f32 %v619_v20, %v417_v17  ;;  %v425_v17 = vld [vmem:[#allocation2 + $0xe0] sm:$0xff] }
 0x1d1   :  { %v574_v22 = vpop.xlane.xlu1 %573  ;;  %v739_v23 = vld [vmem:[#allocation2 + $0x90] sm:$0xff] }
 0x1d2   :  { %v658_v24 = vadd.f32 %v574_v22, %v402_v19  ;;  %771 = vst.msk [vmem:[%s1326_s2 + $0x90] sm:$0xff] %vm43_vm0, %v739_v23  ;;  %706 = vst.msk [vmem:[#allocation2 + $0xa0] sm:$0xff] %vm43_vm0, %v673_v21  ;;  %v410_v19 = vld [vmem:[#allocation2 + $0x68] sm:$0xff] }
 0x1d3   :  { %v724_v26 = vld [vmem:[#allocation2 + $0x18] sm:$0xff]  ;;  %v577_v28 = vpop.xlane.xlu0 %576 }
 0x1d4   :  { %756 = vst.msk [vmem:[%s1326_s2 + $0x18] sm:$0xff] %vm43_vm0, %v724_v26  ;;  %691 = vst.msk [vmem:[#allocation2 + $0x28] sm:$0xff] %vm43_vm0, %v658_v24  ;;  %v659_v30 = vadd.f32 %v577_v28, %v403_v25  ;;  %v411_v25 = vld [vmem:[#allocation2 + $0x70] sm:$0xff] }
 0x1d5   :  { %v622_v29 = vpop.xlane.xlu1 %621  ;;  %v725_v31 = vld [vmem:[#allocation2 + $0x20] sm:$0xff] }
 0x1d6   :  { %v674_v32 = vadd.f32 %v622_v29, %v418_v27  ;;  %757 = vst.msk [vmem:[%s1326_s2 + $0x20] sm:$0xff] %vm43_vm0, %v725_v31  ;;  %692 = vst.msk [vmem:[#allocation2 + $0x30] sm:$0xff] %vm43_vm0, %v659_v30  ;;  %v426_v27 = vld [vmem:[#allocation2 + $0xe8] sm:$0xff] }
 0x1d7   :  { %v740_v33 = vld [vmem:[#allocation2 + $0x98] sm:$0xff]  ;;  %v625_v35 = vpop.xlane.xlu0 %624 }
 0x1d8   :  { %772 = vst.msk [vmem:[%s1326_s2 + $0x98] sm:$0xff] %vm43_vm0, %v740_v33  ;;  %707 = vst.msk [vmem:[#allocation2 + $0xa8] sm:$0xff] %vm43_vm0, %v674_v32  ;;  %v675_v36 = vadd.f32 %v625_v35, %v419_v0  ;;  %v427_v0 = vld [vmem:[#allocation2 + $0xf0] sm:$0xff] }
 0x1d9   :  { %v580_v37 = vpop.xlane.xlu1 %579  ;;  %v741_v38 = vld [vmem:[#allocation2 + $0xa0] sm:$0xff] }
 0x1da   :  { %v660_v39 = vadd.f32 %v580_v37, %v404_v34  ;;  %773 = vst.msk [vmem:[%s1326_s2 + $0xa0] sm:$0xff] %vm43_vm0, %v741_v38  ;;  %708 = vst.msk [vmem:[#allocation2 + $0xb0] sm:$0xff] %vm43_vm0, %v675_v36  ;;  %v412_v34 = vld [vmem:[#allocation2 + $0x78] sm:$0xff] }
 0x1db   :  { %v726_v41 = vld [vmem:[#allocation2 + $0x28] sm:$0xff]  ;;  %v583_v43 = vpop.xlane.xlu0 %582 }
 0x1dc   :  { %758 = vst.msk [vmem:[%s1326_s2 + $0x28] sm:$0xff] %vm43_vm0, %v726_v41  ;;  %693 = vst.msk [vmem:[#allocation2 + $0x38] sm:$0xff] %vm43_vm0, %v660_v39  ;;  %v661_v45 = vadd.f32 %v583_v43, %v405_v40  ;;  %v428_v41 = vld [vmem:[#allocation2 + $0xf8] sm:$0xff] }
 0x1dd   :  { %v628_v44 = vpop.xlane.xlu1 %627  ;;  %v727_v46 = vld [vmem:[#allocation2 + $0x30] sm:$0xff] }
 0x1de   :  { %v676_v47 = vadd.f32 %v628_v44, %v420_v42  ;;  %759 = vst.msk [vmem:[%s1326_s2 + $0x30] sm:$0xff] %vm43_vm0, %v727_v46  ;;  %694 = vst.msk [vmem:[#allocation2 + $0x40] sm:$0xff] %vm43_vm0, %v661_v45 }
 0x1df   :  { %v742_v49 = vld [vmem:[#allocation2 + $0xa8] sm:$0xff]  ;;  %v631_v51 = vpop.xlane.xlu0 %630 }
 0x1e0   :  { %774 = vst.msk [vmem:[%s1326_s2 + $0xa8] sm:$0xff] %vm43_vm0, %v742_v49  ;;  %709 = vst.msk [vmem:[#allocation2 + $0xb8] sm:$0xff] %vm43_vm0, %v676_v47  ;;  %v677_v52 = vadd.f32 %v631_v51, %v421_v48 }
 0x1e1   :  { %v586_v53 = vpop.xlane.xlu1 %585  ;;  %v743_v54 = vld [vmem:[#allocation2 + $0xb0] sm:$0xff] }
 0x1e2   :  { %v662_v55 = vadd.f32 %v586_v53, %v406_v50  ;;  %775 = vst.msk [vmem:[%s1326_s2 + $0xb0] sm:$0xff] %vm43_vm0, %v743_v54  ;;  %710 = vst.msk [vmem:[#allocation2 + $0xc0] sm:$0xff] %vm43_vm0, %v677_v52 }
 0x1e3   :  { %v728_v57 = vld [vmem:[#allocation2 + $0x38] sm:$0xff]  ;;  %v589_v59 = vpop.xlane.xlu0 %588 }
 0x1e4   :  { %760 = vst.msk [vmem:[%s1326_s2 + $0x38] sm:$0xff] %vm43_vm0, %v728_v57  ;;  %695 = vst.msk [vmem:[#allocation2 + $0x48] sm:$0xff] %vm43_vm0, %v662_v55  ;;  %v663_v61 = vadd.f32 %v589_v59, %v407_v56 }
 0x1e5   :  { %v634_v60 = vpop.xlane.xlu1 %633  ;;  %v729_v62 = vld [vmem:[#allocation2 + $0x40] sm:$0xff] }
 0x1e6   :  { %v678_v63 = vadd.f32 %v634_v60, %v422_v58  ;;  %761 = vst.msk [vmem:[%s1326_s2 + $0x40] sm:$0xff] %vm43_vm0, %v729_v62  ;;  %696 = vst.msk [vmem:[#allocation2 + $0x50] sm:$0xff] %vm43_vm0, %v663_v61 }
 0x1e7   :  { %v744_v2 = vld [vmem:[#allocation2 + $0xb8] sm:$0xff]  ;;  %v637_v4 = vpop.xlane.xlu0 %636 }
 0x1e8   :  { %776 = vst.msk [vmem:[%s1326_s2 + $0xb8] sm:$0xff] %vm43_vm0, %v744_v2  ;;  %711 = vst.msk [vmem:[#allocation2 + $0xc8] sm:$0xff] %vm43_vm0, %v678_v63  ;;  %v679_v5 = vadd.f32 %v637_v4, %v423_v1 }
 0x1e9   :  { %v592_v6 = vpop.xlane.xlu1 %591  ;;  %v745_v7 = vld [vmem:[#allocation2 + $0xc0] sm:$0xff] }
 0x1ea   :  { %v664_v8 = vadd.f32 %v592_v6, %v408_v3  ;;  %777 = vst.msk [vmem:[%s1326_s2 + $0xc0] sm:$0xff] %vm43_vm0, %v745_v7  ;;  %712 = vst.msk [vmem:[#allocation2 + $0xd0] sm:$0xff] %vm43_vm0, %v679_v5 }
 0x1eb   :  { %v730_v10 = vld [vmem:[#allocation2 + $0x48] sm:$0xff]  ;;  %v595_v12 = vpop.xlane.xlu0 %594 }
 0x1ec   :  { %762 = vst.msk [vmem:[%s1326_s2 + $0x48] sm:$0xff] %vm43_vm0, %v730_v10  ;;  %697 = vst.msk [vmem:[#allocation2 + $0x58] sm:$0xff] %vm43_vm0, %v664_v8  ;;  %v665_v14 = vadd.f32 %v595_v12, %v409_v9 }
 0x1ed   :  { %v640_v13 = vpop.xlane.xlu1 %639  ;;  %v731_v15 = vld [vmem:[#allocation2 + $0x50] sm:$0xff] }
 0x1ee   :  { %v680_v16 = vadd.f32 %v640_v13, %v424_v11  ;;  %763 = vst.msk [vmem:[%s1326_s2 + $0x50] sm:$0xff] %vm43_vm0, %v731_v15  ;;  %698 = vst.msk [vmem:[#allocation2 + $0x60] sm:$0xff] %vm43_vm0, %v665_v14 }
 0x1ef   :  { %v746_v18 = vld [vmem:[#allocation2 + $0xc8] sm:$0xff]  ;;  %v643_v20 = vpop.xlane.xlu0 %642 }
 0x1f0   :  { %778 = vst.msk [vmem:[%s1326_s2 + $0xc8] sm:$0xff] %vm43_vm0, %v746_v18  ;;  %713 = vst.msk [vmem:[#allocation2 + $0xd8] sm:$0xff] %vm43_vm0, %v680_v16  ;;  %v681_v21 = vadd.f32 %v643_v20, %v425_v17 }
 0x1f1   :  { %v598_v22 = vpop.xlane.xlu1 %597  ;;  %v747_v23 = vld [vmem:[#allocation2 + $0xd0] sm:$0xff] }
 0x1f2   :  { %v666_v24 = vadd.f32 %v598_v22, %v410_v19  ;;  %779 = vst.msk [vmem:[%s1326_s2 + $0xd0] sm:$0xff] %vm43_vm0, %v747_v23  ;;  %714 = vst.msk [vmem:[#allocation2 + $0xe0] sm:$0xff] %vm43_vm0, %v681_v21 }
 0x1f3   :  { %v732_v26 = vld [vmem:[#allocation2 + $0x58] sm:$0xff]  ;;  %v601_v28 = vpop.xlane.xlu0 %600 }
 0x1f4   :  { %764 = vst.msk [vmem:[%s1326_s2 + $0x58] sm:$0xff] %vm43_vm0, %v732_v26  ;;  %699 = vst.msk [vmem:[#allocation2 + $0x68] sm:$0xff] %vm43_vm0, %v666_v24  ;;  %v667_v30 = vadd.f32 %v601_v28, %v411_v25 }
 0x1f5   :  { %v646_v29 = vpop.xlane.xlu1 %645  ;;  %v733_v31 = vld [vmem:[#allocation2 + $0x60] sm:$0xff] }
 0x1f6   :  { %v682_v32 = vadd.f32 %v646_v29, %v426_v27  ;;  %765 = vst.msk [vmem:[%s1326_s2 + $0x60] sm:$0xff] %vm43_vm0, %v733_v31  ;;  %700 = vst.msk [vmem:[#allocation2 + $0x70] sm:$0xff] %vm43_vm0, %v667_v30 }
 0x1f7   :  { %v748_v33 = vld [vmem:[#allocation2 + $0xd8] sm:$0xff]  ;;  %v649_v35 = vpop.xlane.xlu0 %648 }
 0x1f8   :  { %780 = vst.msk [vmem:[%s1326_s2 + $0xd8] sm:$0xff] %vm43_vm0, %v748_v33  ;;  %715 = vst.msk [vmem:[#allocation2 + $0xe8] sm:$0xff] %vm43_vm0, %v682_v32  ;;  %v683_v36 = vadd.f32 %v649_v35, %v427_v0 }
 0x1f9   :  { %v604_v37 = vpop.xlane.xlu1 %603  ;;  %v749_v38 = vld [vmem:[#allocation2 + $0xe0] sm:$0xff] }
 0x1fa   :  { %v668_v39 = vadd.f32 %v604_v37, %v412_v34  ;;  %781 = vst.msk [vmem:[%s1326_s2 + $0xe0] sm:$0xff] %vm43_vm0, %v749_v38  ;;  %716 = vst.msk [vmem:[#allocation2 + $0xf0] sm:$0xff] %vm43_vm0, %v683_v36 }
 0x1fb   :  { %v734_v40 = vld [vmem:[#allocation2 + $0x68] sm:$0xff] }
 0x1fc   :  { %766 = vst.msk [vmem:[%s1326_s2 + $0x68] sm:$0xff] %vm43_vm0, %v734_v40  ;;  %701 = vst.msk [vmem:[#allocation2 + $0x78] sm:$0xff] %vm43_vm0, %v668_v39 }
 0x1fd   :  { %v652_v42 = vpop.xlane.xlu1 %651  ;;  %v735_v43 = vld [vmem:[#allocation2 + $0x70] sm:$0xff] }
 0x1fe   :  { %v684_v44 = vadd.f32 %v652_v42, %v428_v41  ;;  %767 = vst.msk [vmem:[%s1326_s2 + $0x70] sm:$0xff] %vm43_vm0, %v735_v43 }
 0x1ff   :  { %v750_v45 = vld [vmem:[#allocation2 + $0xe8] sm:$0xff] }
 0x200   :  { %782 = vst.msk [vmem:[%s1326_s2 + $0xe8] sm:$0xff] %vm43_vm0, %v750_v45  ;;  %717 = vst.msk [vmem:[#allocation2 + $0xf8] sm:$0xff] %vm43_vm0, %v684_v44 }
 0x201   :  { %v751_v46 = vld [vmem:[#allocation2 + $0xf0] sm:$0xff] }
 0x202   :  { %783 = vst.msk [vmem:[%s1326_s2 + $0xf0] sm:$0xff] %vm43_vm0, %v751_v46 }
 0x203   :  { %v736_v47 = vld [vmem:[#allocation2 + $0x78] sm:$0xff] }
 0x204   :  { %768 = vst.msk [vmem:[%s1326_s2 + $0x78] sm:$0xff] %vm43_vm0, %v736_v47 }
 0x207   :  { %v752_v48 = vld [vmem:[#allocation2 + $0xf8] sm:$0xff] }
 0x208   :  { %784 = vst.msk [vmem:[%s1326_s2 + $0xf8] sm:$0xff] %vm43_vm0, %v752_v48 }
 0x209   :  { %789 = vsyncpa [#allocation4], 1 }
 0x20a   :  { %790 = vsyncpa [#allocation6], 1 }

</bundles_post_ra>
